<compile_context>
chip_gen: v5e
topology: v5e:2x2
jax: 0.10.0
libtpu: 0.0.40
codegen_flags: <defaults>
</compile_context>

<pallas_src>
import jax
import jax.numpy as jnp
from jax.experimental import pallas as pl
from jax.experimental.pallas import tpu as pltpu


def _round_up(n, m):
    return ((n + m - 1) // m) * m


def _triplet_kernel(x1_ref, x2_ref, x3_ref, w1_ref, b1_ref, w2_ref, b2_ref,
                    o_ref, xcat_ref):
    # x{1,2,3}: (B, D) bf16    w1: (D, H) bf16    b1: (1, H)  f32
    # w2: (H, Ep) bf16         b2: (1, Ep) f32    o: (Mp, Ep) f32
    # xcat scratch: (Mp, D) bf16
    b = x1_ref.shape[0]
    d = x1_ref.shape[1]
    m_pad = xcat_ref.shape[0]

    # Fold the three branches into one (Mp, D) matrix via direct scratch
    # stores (no jnp.concatenate -> no sublane-packing copy).
    xcat_ref[pl.ds(0 * b, b), :] = x1_ref[...]
    xcat_ref[pl.ds(1 * b, b), :] = x2_ref[...]
    xcat_ref[pl.ds(2 * b, b), :] = x3_ref[...]
    if m_pad > 3 * b:  # zero only the sublane-pad rows (static check)
        xcat_ref[pl.ds(3 * b, m_pad - 3 * b), :] = jnp.zeros(
            (m_pad - 3 * b, d), xcat_ref.dtype)

    # bf16 operands feed the MXU at native rate; accumulate in f32.
    h = jnp.dot(xcat_ref[...], w1_ref[...],
                preferred_element_type=jnp.float32)          # (Mp, H) f32
    h = jnp.maximum(h + b1_ref[...], 0.0)                    # bias + ReLU, f32

    e = jnp.dot(h.astype(jnp.bfloat16), w2_ref[...],
                preferred_element_type=jnp.float32)          # (Mp, Ep) f32
    o_ref[...] = (e + b2_ref[...]).astype(o_ref.dtype)


def prep_params(w1, b1, w2, b2):
    """One-time weight prep (do NOT call per forward).

    Pads only the embedding dim to a lane-dense 128 multiple and casts the
    matmul operands to bf16.  Returns ready-to-use kernel params.
    """
    D, H = w1.shape
    E = w2.shape[1]
    Ep = _round_up(E, 128)

    w1b = w1.astype(jnp.bfloat16)                                    # (D, H)
    b1f = b1.reshape(1, H).astype(jnp.float32)                       # (1, H)
    w2p = jnp.pad(w2, ((0, 0), (0, Ep - E))).astype(jnp.bfloat16)    # (H, Ep)
    b2p = jnp.pad(b2.reshape(1, E),
                  ((0, 0), (0, Ep - E))).astype(jnp.float32)         # (1, Ep)
    return w1b, b1f, w2p, b2p, E


def triplet_forward(x1, x2, x3, w1b, b1f, w2p, b2p, emb_dim):
    """Shared-weight base_net applied to (x1, x2, x3); each input is NCHW."""
    B = x1.shape[0]
    D, H = w1b.shape
    Ep = w2p.shape[1]
    Mp = _round_up(3 * B, 8)       # sublane-aligned folded row count

    bf16 = jnp.bfloat16
    # Free views: flatten NCHW -> (B, D); ship activations as bf16 (half DMA).
    x1f = x1.reshape(B, D).astype(bf16)
    x2f = x2.reshape(B, D).astype(bf16)
    x3f = x3.reshape(B, D).astype(bf16)

    flops = 2 * Mp * (D * H + H * Ep)
    bytes_accessed = (3 * B * D) * 2 + (D * H + H * Ep) * 2 \
        + (H + Ep) * 4 + Mp * Ep * 4

    out = pl.pallas_call(
        _triplet_kernel,
        out_shape=jax.ShapeDtypeStruct((Mp, Ep), jnp.float32),
        grid_spec=pltpu.PrefetchScalarGridSpec(
            num_scalar_prefetch=0,
            grid=(1,),  # all three branches handled in one step
            in_specs=[
                pl.BlockSpec((B, D), lambda i: (0, 0)),     # x1
                pl.BlockSpec((B, D), lambda i: (0, 0)),     # x2
                pl.BlockSpec((B, D), lambda i: (0, 0)),     # x3
                pl.BlockSpec((D, H), lambda i: (0, 0)),     # w1 (unpadded H)
                pl.BlockSpec((1, H), lambda i: (0, 0)),     # b1
                pl.BlockSpec((H, Ep), lambda i: (0, 0)),    # w2 (lane-dense N)
                pl.BlockSpec((1, Ep), lambda i: (0, 0)),    # b2
            ],
            out_specs=pl.BlockSpec((Mp, Ep), lambda i: (0, 0)),
            scratch_shapes=[pltpu.VMEM((Mp, D), bf16)],     # folded activations
        ),
        compiler_params=pltpu.CompilerParams(
            dimension_semantics=("arbitrary",),
        ),
        cost_estimate=pl.CostEstimate(
            flops=flops, transcendentals=0, bytes_accessed=bytes_accessed),
    )(x1f, x2f, x3f, w1b, b1f, w2p, b2p)

    # Drop lane/row padding and split back into the three branch embeddings.
    out = out[:3 * B, :emb_dim]
    return out[:B], out[B:2 * B], out[2 * B:3 * B]


def _init_params(key, D, H, E):
    """PyTorch-Linear-style init: U(-1/sqrt(fan_in), 1/sqrt(fan_in))."""
    k1, k2, k3, k4 = jax.random.split(key, 4)
    lim1 = 1.0 / jnp.sqrt(jnp.float32(D))
    lim2 = 1.0 / jnp.sqrt(jnp.float32(H))
    w1 = jax.random.uniform(k1, (D, H), jnp.float32, -lim1, lim1)
    b1 = jax.random.uniform(k2, (1, H), jnp.float32, -lim1, lim1)
    w2 = jax.random.uniform(k3, (H, E), jnp.float32, -lim2, lim2)
    b2 = jax.random.uniform(k4, (1, E), jnp.float32, -lim2, lim2)
    return w1, b1, w2, b2


if __name__ == "__main__":
    # Small shapes: batch=2, channels=4, spatial=16x16 (NCHW, as in PyTorch).
    B, C, Hs, Ws = 2, 4, 16, 16
    D = C * Hs * Ws          # 1024 flattened features
    Hd = 32                  # hidden width
    E = 16                   # embedding dim

    key = jax.random.PRNGKey(0)
    kx1, kx2, kx3, kp = jax.random.split(key, 4)
    x1 = jax.random.normal(kx1, (B, C, Hs, Ws), jnp.float32)
    x2 = jax.random.normal(kx2, (B, C, Hs, Ws), jnp.float32)
    x3 = jax.random.normal(kx3, (B, C, Hs, Ws), jnp.float32)
    w1, b1, w2, b2 = _init_params(kp, D, Hd, E)

    # One-time weight prep (hoisted out of the per-call path).
    w1b, b1f, w2p, b2p, emb_dim = prep_params(w1, b1, w2, b2)
    w1b, b1f, w2p, b2p = jax.block_until_ready((w1b, b1f, w2p, b2p))

    o1, o2, o3 = triplet_forward(x1, x2, x3, w1b, b1f, w2p, b2p, emb_dim)
    jax.block_until_ready((o1, o2, o3))

    # Reference in plain f32 JAX (same base_net applied three times).
    def base_ref(x):
        h = jnp.maximum(x.reshape(B, D) @ w1 + b1, 0.0)
        return h @ w2 + b2

    r1, r2, r3 = base_ref(x1), base_ref(x2), base_ref(x3)
    # bf16 MXU operands -> loosened tolerance vs. the f32 reference.
    assert jnp.allclose(o1, r1, atol=3e-2, rtol=3e-2), "branch 1 mismatch"
    assert jnp.allclose(o2, r2, atol=3e-2, rtol=3e-2), "branch 2 mismatch"
    assert jnp.allclose(o3, r3, atol=3e-2, rtol=3e-2), "branch 3 mismatch"

    print("KERNEL_OK")
</pallas_src>

<mosaic_0001>
module attributes {stable_mosaic.version = 11 : i64} {
  func.func @_triplet_kernel(%arg0: i32, %arg1: memref<2x1024xbf16, #tpu.memory_space<vmem>>, %arg2: memref<2x1024xbf16, #tpu.memory_space<vmem>>, %arg3: memref<2x1024xbf16, #tpu.memory_space<vmem>>, %arg4: memref<1024x32xbf16, #tpu.memory_space<vmem>>, %arg5: memref<1x32xf32, #tpu.memory_space<vmem>>, %arg6: memref<32x128xbf16, #tpu.memory_space<vmem>>, %arg7: memref<1x128xf32, #tpu.memory_space<vmem>>, %arg8: memref<8x128xf32, #tpu.memory_space<vmem>>, %arg9: memref<8x1024xbf16, #tpu.memory_space<vmem>>) attributes {dimension_semantics = [#tpu.dimension_semantics<arbitrary>], iteration_bounds = array<i64: 1>, scalar_prefetch = 0 : i64, scratch_operands = 1 : i64, tpu.core_type = #tpu.core_type<tc>, window_params = [{pipeline_mode = #tpu.pipeline_mode<synchronous>, transform_indices = @transform_0, window_bounds = array<i64: 2, 1024>}, {pipeline_mode = #tpu.pipeline_mode<synchronous>, transform_indices = @transform_1, window_bounds = array<i64: 2, 1024>}, {pipeline_mode = #tpu.pipeline_mode<synchronous>, transform_indices = @transform_2, window_bounds = array<i64: 2, 1024>}, {pipeline_mode = #tpu.pipeline_mode<synchronous>, transform_indices = @transform_3, window_bounds = array<i64: 1024, 32>}, {pipeline_mode = #tpu.pipeline_mode<synchronous>, transform_indices = @transform_4, window_bounds = array<i64: 1, 32>}, {pipeline_mode = #tpu.pipeline_mode<synchronous>, transform_indices = @transform_5, window_bounds = array<i64: 32, 128>}, {pipeline_mode = #tpu.pipeline_mode<synchronous>, transform_indices = @transform_6, window_bounds = array<i64: 1, 128>}, {pipeline_mode = #tpu.pipeline_mode<synchronous>, transform_indices = @transform_7, window_bounds = array<i64: 8, 128>}]} {
    %c0 = arith.constant 0 : index
    %c0_0 = arith.constant 0 : index
    %0 = vector.load %arg1[%c0, %c0_0] : memref<2x1024xbf16, #tpu.memory_space<vmem>>, vector<2x1024xbf16>
    %c0_1 = arith.constant 0 : index
    %c0_2 = arith.constant 0 : index
    %1 = vector.load %arg9[%c0_1, %c0_2] : memref<8x1024xbf16, #tpu.memory_space<vmem>>, vector<2x1024xbf16>
    tpu.vector_store %arg9[%c0_1, %c0_2], %0 {strides = array<i32>} : memref<8x1024xbf16, #tpu.memory_space<vmem>>, vector<2x1024xbf16>,
    %c0_3 = arith.constant 0 : index
    %c0_4 = arith.constant 0 : index
    %2 = vector.load %arg2[%c0_3, %c0_4] : memref<2x1024xbf16, #tpu.memory_space<vmem>>, vector<2x1024xbf16>
    %c2 = arith.constant 2 : index
    %c0_5 = arith.constant 0 : index
    %3 = vector.load %arg9[%c2, %c0_5] : memref<8x1024xbf16, #tpu.memory_space<vmem>>, vector<2x1024xbf16>
    tpu.vector_store %arg9[%c2, %c0_5], %2 {strides = array<i32>} : memref<8x1024xbf16, #tpu.memory_space<vmem>>, vector<2x1024xbf16>,
    %c0_6 = arith.constant 0 : index
    %c0_7 = arith.constant 0 : index
    %4 = vector.load %arg3[%c0_6, %c0_7] : memref<2x1024xbf16, #tpu.memory_space<vmem>>, vector<2x1024xbf16>
    %c4 = arith.constant 4 : index
    %c0_8 = arith.constant 0 : index
    %5 = vector.load %arg9[%c4, %c0_8] : memref<8x1024xbf16, #tpu.memory_space<vmem>>, vector<2x1024xbf16>
    tpu.vector_store %arg9[%c4, %c0_8], %4 {strides = array<i32>} : memref<8x1024xbf16, #tpu.memory_space<vmem>>, vector<2x1024xbf16>,
    %cst = arith.constant 0.000000e+00 : bf16
    %6 = vector.broadcast %cst : bf16 to vector<2x1024xbf16>
    %c6 = arith.constant 6 : index
    %c0_9 = arith.constant 0 : index
    %7 = vector.load %arg9[%c6, %c0_9] : memref<8x1024xbf16, #tpu.memory_space<vmem>>, vector<2x1024xbf16>
    tpu.vector_store %arg9[%c6, %c0_9], %6 {strides = array<i32>} : memref<8x1024xbf16, #tpu.memory_space<vmem>>, vector<2x1024xbf16>,
    %c0_10 = arith.constant 0 : index
    %c0_11 = arith.constant 0 : index
    %8 = vector.load %arg9[%c0_10, %c0_11] : memref<8x1024xbf16, #tpu.memory_space<vmem>>, vector<8x1024xbf16>
    %c0_12 = arith.constant 0 : index
    %c0_13 = arith.constant 0 : index
    %9 = vector.load %arg4[%c0_12, %c0_13] : memref<1024x32xbf16, #tpu.memory_space<vmem>>, vector<1024x32xbf16>
    %cst_14 = arith.constant dense<0.000000e+00> : vector<8x32xf32>
    %10 = tpu.matmul %8, %9, %cst_14 {dimension_numbers = #tpu.dot_dimension_numbers<[1], [0], [0], [1], [0, 0, 1, 1], [], []>} : vector<8x1024xbf16>, vector<1024x32xbf16>, vector<8x32xf32> -> vector<8x32xf32>
    %c0_15 = arith.constant 0 : index
    %c0_16 = arith.constant 0 : index
    %11 = vector.load %arg5[%c0_15, %c0_16] : memref<1x32xf32, #tpu.memory_space<vmem>>, vector<1x32xf32>
    %12 = vector.broadcast %11 : vector<1x32xf32> to vector<8x32xf32>
    %13 = arith.addf %10, %12 : vector<8x32xf32>
    %cst_17 = arith.constant 0.000000e+00 : f32
    %14 = vector.broadcast %cst_17 : f32 to vector<8x32xf32>
    %15 = arith.maximumf %13, %14 : vector<8x32xf32>
    %16 = arith.truncf %15 : vector<8x32xf32> to vector<8x32xbf16>
    %c0_18 = arith.constant 0 : index
    %c0_19 = arith.constant 0 : index
    %17 = vector.load %arg6[%c0_18, %c0_19] : memref<32x128xbf16, #tpu.memory_space<vmem>>, vector<32x128xbf16>
    %cst_20 = arith.constant dense<0.000000e+00> : vector<8x128xf32>
    %18 = tpu.matmul %16, %17, %cst_20 {dimension_numbers = #tpu.dot_dimension_numbers<[1], [0], [0], [1], [0, 0, 1, 1], [], []>} : vector<8x32xbf16>, vector<32x128xbf16>, vector<8x128xf32> -> vector<8x128xf32>
    %c0_21 = arith.constant 0 : index
    %c0_22 = arith.constant 0 : index
    %19 = vector.load %arg7[%c0_21, %c0_22] : memref<1x128xf32, #tpu.memory_space<vmem>>, vector<1x128xf32>
    %20 = vector.broadcast %19 : vector<1x128xf32> to vector<8x128xf32>
    %21 = arith.addf %18, %20 : vector<8x128xf32>
    %c0_23 = arith.constant 0 : index
    %c0_24 = arith.constant 0 : index
    %22 = vector.load %arg8[%c0_23, %c0_24] : memref<8x128xf32, #tpu.memory_space<vmem>>, vector<8x128xf32>
    tpu.vector_store %arg8[%c0_23, %c0_24], %21 {strides = array<i32>} : memref<8x128xf32, #tpu.memory_space<vmem>>, vector<8x128xf32>,
    return
  }
  func.func @transform_0(%arg0: i32) -> (i32, i32) {
    %c0_i32 = arith.constant 0 : i32
    %c0_i32_0 = arith.constant 0 : i32
    %c0_i32_1 = arith.constant 0 : i32
    return %c0_i32, %c0_i32_0 : i32, i32
  }
  func.func @transform_1(%arg0: i32) -> (i32, i32) {
    %c0_i32 = arith.constant 0 : i32
    %c0_i32_0 = arith.constant 0 : i32
    %c0_i32_1 = arith.constant 0 : i32
    return %c0_i32, %c0_i32_0 : i32, i32
  }
  func.func @transform_2(%arg0: i32) -> (i32, i32) {
    %c0_i32 = arith.constant 0 : i32
    %c0_i32_0 = arith.constant 0 : i32
    %c0_i32_1 = arith.constant 0 : i32
    return %c0_i32, %c0_i32_0 : i32, i32
  }
  func.func @transform_3(%arg0: i32) -> (i32, i32) {
    %c0_i32 = arith.constant 0 : i32
    %c0_i32_0 = arith.constant 0 : i32
    %c0_i32_1 = arith.constant 0 : i32
    return %c0_i32, %c0_i32_0 : i32, i32
  }
  func.func @transform_4(%arg0: i32) -> (i32, i32) {
    %c0_i32 = arith.constant 0 : i32
    %c0_i32_0 = arith.constant 0 : i32
    %c0_i32_1 = arith.constant 0 : i32
    return %c0_i32, %c0_i32_0 : i32, i32
  }
  func.func @transform_5(%arg0: i32) -> (i32, i32) {
    %c0_i32 = arith.constant 0 : i32
    %c0_i32_0 = arith.constant 0 : i32
    %c0_i32_1 = arith.constant 0 : i32
    return %c0_i32, %c0_i32_0 : i32, i32
  }
  func.func @transform_6(%arg0: i32) -> (i32, i32) {
    %c0_i32 = arith.constant 0 : i32
    %c0_i32_0 = arith.constant 0 : i32
    %c0_i32_1 = arith.constant 0 : i32
    return %c0_i32, %c0_i32_0 : i32, i32
  }
  func.func @transform_7(%arg0: i32) -> (i32, i32) {
    %c0_i32 = arith.constant 0 : i32
    %c0_i32_0 = arith.constant 0 : i32
    %c0_i32_1 = arith.constant 0 : i32
    return %c0_i32, %c0_i32_0 : i32, i32
  }
}

</mosaic_0001>

<bundles_post_ra>
// kernel: tpu_custom_call.1
= control target key start
LH: loop header
LB: loop body
LE: loop exit
PB: predicated region body
PF: predicated region fallthrough
CT: control target
= control target key end

     0   :  { %v1148_v12 = vmov 0   ;;  %s1406_s0 = inlined_call_operand.vmem [shape: bf16[2,1024], index: 0, kind: input, shape index: {}]   ;;  %s1407_s1 = inlined_call_operand.vmem [shape: bf16[2,1024], index: 1, kind: input, shape index: {}]   ;;  %s1408_s2 = inlined_call_operand.vmem [shape: bf16[2,1024], index: 2, kind: input, shape index: {}]   ;;  %s1409_s3 = inlined_call_operand.vmem [shape: bf16[1024,32], index: 3, kind: input, shape index: {}]   ;;  %s1410_s4 = inlined_call_operand.vmem [shape: f32[1,32], index: 4, kind: input, shape index: {}]   ;;  %s1411_s5 = inlined_call_operand.vmem [shape: bf16[32,128], index: 5, kind: input, shape index: {}]   ;;  %s1412_s6 = inlined_call_operand.vmem [shape: f32[1,128], index: 6, kind: input, shape index: {}]   ;;  %s1413_s7 = inlined_call_operand.hbm [shape: f32[8,128], index: 7, kind: output, shape index: {}]  }
   0x1   :  { %v1059_v0 = vld [vmem:[%s1409_s3 + $0x38] sm:$0xff]  ;;  %v1058_v4 = vld [vmem:[%s1409_s3 + $0x30] sm:$0xff]  ;;  %v1057_v8 = vld [vmem:[%s1409_s3 + $0x28] sm:$0xff]  ;;  %76 = vst [vmem:[#allocation2] sm:$0x88] %v1148_v12 }
   0x2   :  { %v1067_v1 = vld [vmem:[%s1409_s3 + $0x78] sm:$0xff]  ;;  %627 = vmatpush.bf16.msra.mxu0 %v1059_v0  ;;  %v1066_v5 = vld [vmem:[%s1409_s3 + $0x70] sm:$0xff]  ;;  %v1065_v9 = vld [vmem:[%s1409_s3 + $0x68] sm:$0xff]  ;;  %75 = vst [vmem:[#allocation2 + $0x10] sm:$0x88] %v1148_v12 }
   0x3   :  { %v1075_v2 = vld [vmem:[%s1409_s3 + $0xb8] sm:$0xff]  ;;  %640 = vmatpush.bf16.msra.mxu1 %v1067_v1  ;;  %v1074_v6 = vld [vmem:[%s1409_s3 + $0xb0] sm:$0xff]  ;;  %v1073_v10 = vld [vmem:[%s1409_s3 + $0xa8] sm:$0xff]  ;;  %77 = vst [vmem:[#allocation2 + $0x18] sm:$0x88] %v1148_v12 }
   0x4   :  { %v1083_v3 = vld [vmem:[%s1409_s3 + $0xf8] sm:$0xff]  ;;  %653 = vmatpush.bf16.msra.mxu2 %v1075_v2  ;;  %v1082_v7 = vld [vmem:[%s1409_s3 + $0xf0] sm:$0xff]  ;;  %v1081_v11 = vld [vmem:[%s1409_s3 + $0xe8] sm:$0xff]  ;;  %78 = vst [vmem:[#allocation2 + $0x8] sm:$0x88] %v1148_v12 }
   0x5   :  { %666 = vmatpush.bf16.msra.mxu3 %v1083_v3  ;;  %v1056_v13 = vld [vmem:[%s1409_s3 + $0x20] sm:$0xff]  ;;  %v1055_v17 = vld [vmem:[%s1409_s3 + $0x18] sm:$0xff] }
   0x6   :  { %628 = vmatpush.bf16.msra.mxu0 %v1058_v4  ;;  %v1064_v14 = vld [vmem:[%s1409_s3 + $0x60] sm:$0xff]  ;;  %v1063_v19 = vld [vmem:[%s1409_s3 + $0x58] sm:$0xff] }
   0x7   :  { %641 = vmatpush.bf16.msra.mxu1 %v1066_v5  ;;  %v1072_v15 = vld [vmem:[%s1409_s3 + $0xa0] sm:$0xff]  ;;  %v1071_v20 = vld [vmem:[%s1409_s3 + $0x98] sm:$0xff] }
   0x8   :  { %654 = vmatpush.bf16.msra.mxu2 %v1074_v6  ;;  %v1080_v16 = vld [vmem:[%s1409_s3 + $0xe0] sm:$0xff]  ;;  %v1079_v21 = vld [vmem:[%s1409_s3 + $0xd8] sm:$0xff] }
   0x9   :  { %667 = vmatpush.bf16.msra.mxu3 %v1082_v7  ;;  %v28_v18 = vld [vmem:[%s1406_s0] sm:$0xff] }
   0xa   :  { %629 = vmatpush.bf16.msra.mxu0 %v1057_v8  ;;  %30 = vst [vmem:[#allocation1] ss:$4 sm:$0xff] %v28_v18 }
   0xb   :  { %642 = vmatpush.bf16.msra.mxu1 %v1065_v9 }
   0xc   :  { %655 = vmatpush.bf16.msra.mxu2 %v1073_v10 }
   0xd   :  { %668 = vmatpush.bf16.msra.mxu3 %v1081_v11 }
   0xe   :  { %630 = vmatpush.bf16.msra.mxu0 %v1056_v13 }
   0xf   :  { %643 = vmatpush.bf16.msra.mxu1 %v1064_v14 }
  0x10   :  { %656 = vmatpush.bf16.msra.mxu2 %v1072_v15 }
  0x11   :  { %669 = vmatpush.bf16.msra.mxu3 %v1080_v16 }
  0x12   :  { %12 = vsyncpa [#allocation4], 0  ;;  %631 = vmatpush.bf16.msra.mxu0 %v1055_v17  ;;  %v1054_v22 = vld [vmem:[%s1409_s3 + $0x10] sm:$0xff]  ;;  %v43_v26 = vld [vmem:[%s1407_s1] sm:$0xff]  ;;  %vm753_vm0 = vcmask 261120   ;;  %s1149_s14 = smov [#allocation3]  }
  0x13   :  { %644 = vmatpush.bf16.msra.mxu1 %v1063_v19  ;;  %v1062_v23 = vld [vmem:[%s1409_s3 + $0x50] sm:$0xff]  ;;  %v31_v27 = vld [vmem:[#allocation1] sm:$0xff]  ;;  %v32_v28 = vld [vmem:[#allocation1 + $0x8] sm:$0xff]  ;;  %s776_s15 = sshll.u32 %s1149_s14, 4  ;;  %s778_s18 = sshll.u32 %s1413_s7, 4  ;;  %s777_s15 = int_to_ptr.vmem [resolvable:$true] %s776_s15  ;;  %s779_s18 = int_to_ptr.hbm [resolvable:$true] %s778_s18 }
  0x14   :  { %657 = vmatpush.bf16.msra.mxu2 %v1071_v20  ;;  %v1070_v24 = vld [vmem:[%s1409_s3 + $0x90] sm:$0xff]  ;;  %v1053_v30 = vld [vmem:[%s1409_s3 + $0x8] sm:$0xff]  ;;  %v34_v32 = vld [vmem:[#allocation1 + $0x18] sm:$0xff]  ;;  %40 = vst [vmem:[#allocation2] sm:$0x11] %v32_v28 }
  0x15   :  { %670 = vmatpush.bf16.msra.mxu3 %v1079_v21  ;;  %v1078_v25 = vld [vmem:[%s1409_s3 + $0xd0] sm:$0xff]  ;;  %v1061_v31 = vld [vmem:[%s1409_s3 + $0x48] sm:$0xff]  ;;  %39 = vst [vmem:[#allocation2 + $0x10] sm:$0x11] %v31_v27  ;;  %v1052_v35 = vld [vmem:[%s1409_s3] sm:$0xff] }
  0x16   :  { %v33_v29 = vld [vmem:[#allocation1 + $0x10] sm:$0xff]  ;;  %632 = vmatpush.bf16.msra.mxu0 %v1054_v22  ;;  %v1069_v33 = vld [vmem:[%s1409_s3 + $0x88] sm:$0xff]  ;;  %v1060_v36 = vld [vmem:[%s1409_s3 + $0x40] sm:$0xff]  ;;  %42 = vst [vmem:[#allocation2 + $0x8] sm:$0x11] %v34_v32 }
  0x17   :  { %645 = vmatpush.bf16.msra.mxu1 %v1062_v23  ;;  %v1077_v34 = vld [vmem:[%s1409_s3 + $0xc8] sm:$0xff]  ;;  %46 = vst [vmem:[#allocation1 + $0x1] ss:$4 sm:$0xff] %v43_v26  ;;  %v1068_v37 = vld [vmem:[%s1409_s3 + $0x80] sm:$0xff]  ;;  %v1091_v39 = vld [vmem:[%s1409_s3 + $0x138] sm:$0xff] }
  0x18   :  { %658 = vmatpush.bf16.msra.mxu2 %v1070_v24  ;;  %41 = vst [vmem:[#allocation2 + $0x18] sm:$0x11] %v33_v29  ;;  %v1076_v38 = vld [vmem:[%s1409_s3 + $0xc0] sm:$0xff]  ;;  %v1099_v40 = vld [vmem:[%s1409_s3 + $0x178] sm:$0xff]  ;;  %v1090_v48 = vld [vmem:[%s1409_s3 + $0x130] sm:$0xff] }
  0x19   :  { %671 = vmatpush.bf16.msra.mxu3 %v1078_v25  ;;  %v1107_v41 = vld [vmem:[%s1409_s3 + $0x1b8] sm:$0xff]  ;;  %v59_v43 = vld [vmem:[%s1408_s2] sm:$0xff]  ;;  %v1098_v49 = vld [vmem:[%s1409_s3 + $0x170] sm:$0xff] }
  0x1a   :  { %633 = vmatpush.bf16.msra.mxu0 %v1053_v30  ;;  %v1115_v42 = vld [vmem:[%s1409_s3 + $0x1f8] sm:$0xff]  ;;  %v1106_v50 = vld [vmem:[%s1409_s3 + $0x1b0] sm:$0xff]  ;;  %v1089_v52 = vld [vmem:[%s1409_s3 + $0x128] sm:$0xff] }
  0x1b   :  { %646 = vmatpush.bf16.msra.mxu1 %v1061_v31  ;;  %v1114_v51 = vld [vmem:[%s1409_s3 + $0x1f0] sm:$0xff]  ;;  %v1097_v53 = vld [vmem:[%s1409_s3 + $0x168] sm:$0xff]  ;;  %v1088_v59 = vld [vmem:[%s1409_s3 + $0x120] sm:$0xff] }
  0x1c   :  { %659 = vmatpush.bf16.msra.mxu2 %v1069_v33  ;;  %v1105_v54 = vld [vmem:[%s1409_s3 + $0x1a8] sm:$0xff]  ;;  %v1096_v60 = vld [vmem:[%s1409_s3 + $0x160] sm:$0xff]  ;;  %v1087_v0 = vld [vmem:[%s1409_s3 + $0x118] sm:$0xff] }
  0x1d   :  { %672 = vmatpush.bf16.msra.mxu3 %v1077_v34  ;;  %v1113_v55 = vld [vmem:[%s1409_s3 + $0x1e8] sm:$0xff]  ;;  %v1104_v62 = vld [vmem:[%s1409_s3 + $0x1a0] sm:$0xff]  ;;  %v1095_v1 = vld [vmem:[%s1409_s3 + $0x158] sm:$0xff] }
  0x1e   :  { %634 = vmatpush.bf16.msra.mxu0 %v1052_v35  ;;  %v47_v44 = vld [vmem:[#allocation1] sm:$0xff]  ;;  %v48_v45 = vld [vmem:[#allocation1 + $0x8] sm:$0xff]  ;;  %v49_v46 = vld [vmem:[#allocation1 + $0x10] sm:$0xff] }
  0x1f   :  { %647 = vmatpush.bf16.msra.mxu1 %v1060_v36  ;;  %v50_v47 = vld [vmem:[#allocation1 + $0x18] sm:$0xff]  ;;  %56 = vst [vmem:[#allocation2] sm:$0x22] %v48_v45  ;;  %v1112_v63 = vld [vmem:[%s1409_s3 + $0x1e0] sm:$0xff]  ;;  %v1086_v12 = vld [vmem:[%s1409_s3 + $0x110] sm:$0xff] }
  0x20   :  { %660 = vmatpush.bf16.msra.mxu2 %v1068_v37  ;;  %62 = vst [vmem:[#allocation1 + $0x2] ss:$4 sm:$0xff] %v59_v43  ;;  %v1103_v2 = vld [vmem:[%s1409_s3 + $0x198] sm:$0xff]  ;;  %v1094_v13 = vld [vmem:[%s1409_s3 + $0x150] sm:$0xff]  ;;  %v1085_v18 = vld [vmem:[%s1409_s3 + $0x108] sm:$0xff] }
  0x21   :  { %673 = vmatpush.bf16.msra.mxu3 %v1076_v38  ;;  %55 = vst [vmem:[#allocation2 + $0x10] sm:$0x22] %v47_v44  ;;  %v1111_v3 = vld [vmem:[%s1409_s3 + $0x1d8] sm:$0xff]  ;;  %v1102_v16 = vld [vmem:[%s1409_s3 + $0x190] sm:$0xff]  ;;  %v1093_v19 = vld [vmem:[%s1409_s3 + $0x148] sm:$0xff] }
  0x22   :  { %679 = vmatpush.bf16.msrb.mxu0 %v1091_v39  ;;  %57 = vst [vmem:[#allocation2 + $0x18] sm:$0x22] %v49_v46  ;;  %v1110_v17 = vld [vmem:[%s1409_s3 + $0x1d0] sm:$0xff]  ;;  %v1101_v20 = vld [vmem:[%s1409_s3 + $0x188] sm:$0xff]  ;;  %v1084_v23 = vld [vmem:[%s1409_s3 + $0x100] sm:$0xff] }
  0x23   :  { %692 = vmatpush.bf16.msrb.mxu1 %v1099_v40  ;;  %58 = vst [vmem:[#allocation2 + $0x8] sm:$0x22] %v50_v47  ;;  %v1109_v21 = vld [vmem:[%s1409_s3 + $0x1c8] sm:$0xff]  ;;  %v1092_v24 = vld [vmem:[%s1409_s3 + $0x140] sm:$0xff] }
  0x24   :  { %705 = vmatpush.bf16.msrb.mxu2 %v1107_v41  ;;  %v1100_v26 = vld [vmem:[%s1409_s3 + $0x180] sm:$0xff]  ;;  %v1117_v36 = vld [vmem:[%s1411_s5 + $0x8] sm:$0xff] }
  0x25   :  { %718 = vmatpush.bf16.msrb.mxu3 %v1115_v42  ;;  %v1108_v27 = vld [vmem:[%s1409_s3 + $0x1c0] sm:$0xff] }
  0x26   :  { %680 = vmatpush.bf16.msrb.mxu0 %v1090_v48  ;;  %v1116_v37 = vld [vmem:[%s1411_s5] sm:$0xff] }
  0x27   :  { %693 = vmatpush.bf16.msrb.mxu1 %v1098_v49  ;;  %v64_v56 = vld [vmem:[#allocation1 + $0x8] sm:$0xff]  ;;  %v63_v57 = vld [vmem:[#allocation1] sm:$0xff]  ;;  %v65_v58 = vld [vmem:[#allocation1 + $0x10] sm:$0xff] }
  0x28   :  { %706 = vmatpush.bf16.msrb.mxu2 %v1106_v50  ;;  %72 = vst [vmem:[#allocation2] sm:$0x44] %v64_v56  ;;  %v66_v61 = vld [vmem:[#allocation1 + $0x18] sm:$0xff]  ;;  %v1120_v38 = vld [vmem:[%s1410_s4] ss:$0 sm:$0xff] }
  0x29   :  { %719 = vmatpush.bf16.msrb.mxu3 %v1114_v51  ;;  %71 = vst [vmem:[#allocation2 + $0x10] sm:$0x44] %v63_v57 }
  0x2a   :  { %681 = vmatpush.bf16.msrb.mxu0 %v1089_v52  ;;  %73 = vst [vmem:[#allocation2 + $0x18] sm:$0x44] %v65_v58 }
  0x2b   :  { %694 = vmatpush.bf16.msrb.mxu1 %v1097_v53  ;;  %74 = vst [vmem:[#allocation2 + $0x8] sm:$0x44] %v66_v61 }
  0x2c   :  { %707 = vmatpush.bf16.msrb.mxu2 %v1105_v54 }
  0x2d   :  { %720 = vmatpush.bf16.msrb.mxu3 %v1113_v55 }
  0x2e   :  { %682 = vmatpush.bf16.msrb.mxu0 %v1088_v59 }
  0x2f   :  { %695 = vmatpush.bf16.msrb.mxu1 %v1096_v60  ;;  %v80_v4 = vld [vmem:[#allocation2] sm:$0xff] }
  0x30   :  { %708 = vmatpush.bf16.msrb.mxu2 %v1104_v62  ;;  %v221_v5 = vunpack.c.l.b16 %v80_v4  ;;  %v79_v6 = vld [vmem:[#allocation2 + $0x10] sm:$0xff]  ;;  %v222_v7 = vunpack.c.h.b16 %v80_v4 }
  0x31   :  { %721 = vmatpush.bf16.msrb.mxu3 %v1112_v63  ;;  %v219_v8 = vunpack.c.l.b16 %v79_v6  ;;  %v220_v9 = vunpack.c.h.b16 %v79_v6  ;;  %v81_v25 = vld [vmem:[#allocation2 + $0x18] sm:$0xff] }
  0x32   :  { %683 = vmatpush.bf16.msrb.mxu0 %v1087_v0  ;;  %v229_v10 = vpack.c.b16 %v221_v5, %v221_v5  ;;  %v230_v11 = vpack.c.b16 %v222_v7, %v222_v7  ;;  %v82_v22 = vld [vmem:[#allocation2 + $0x8] sm:$0xff]  ;;  %v223_v30 = vunpack.c.l.b16 %v81_v25  ;;  %v224_v31 = vunpack.c.h.b16 %v81_v25 }
  0x33   :  { %696 = vmatpush.bf16.msrb.mxu1 %v1095_v1  ;;  %v227_v14 = vpack.c.b16 %v219_v8, %v219_v8  ;;  %v228_v15 = vpack.c.b16 %v220_v9, %v220_v9  ;;  %v225_v28 = vunpack.c.l.b16 %v82_v22  ;;  %v226_v29 = vunpack.c.h.b16 %v82_v22  ;;  %v1121_v1 = vld [vmem:[%s1412_s6] ss:$0 sm:$0xff] }
  0x34   :  { %709 = vmatpush.bf16.msrb.mxu2 %v1103_v2  ;;  %674 = vmatmul.bf16.vlgmr.msra.gmra.mxu3 %v230_v11  ;;  %v231_v34 = vpack.c.b16 %v223_v30, %v223_v30  ;;  %v232_v35 = vpack.c.b16 %v224_v31, %v224_v31 }
  0x35   :  { %722 = vmatpush.bf16.msrb.mxu3 %v1111_v3  ;;  %661 = vmatmul.bf16.vlgmr.msra.gmra.mxu2 %v229_v10  ;;  %v233_v32 = vpack.c.b16 %v225_v28, %v225_v28  ;;  %v234_v33 = vpack.c.b16 %v226_v29, %v226_v29 }
  0x36   :  { %635 = vmatmul.bf16.vlgmr.msra.gmra.mxu0 %v227_v14  ;;  %648 = vmatmul.bf16.vlgmr.msra.gmra.mxu1 %v228_v15 }
  0x37   :  { %684 = vmatpush.bf16.msrb.mxu0 %v1086_v12  ;;  %697 = vmatpush.bf16.msrb.mxu1 %v1094_v13 }
  0x38   :  { %710 = vmatpush.bf16.msrb.mxu2 %v1102_v16 }
  0x39   :  { %723 = vmatpush.bf16.msrb.mxu3 %v1110_v17 }
  0x3b   :  { %685 = vmatpush.bf16.msrb.mxu0 %v1085_v18  ;;  %698 = vmatpush.bf16.msrb.mxu1 %v1093_v19 }
  0x3c   :  { %711 = vmatpush.bf16.msrb.mxu2 %v1101_v20 }
  0x3d   :  { %724 = vmatpush.bf16.msrb.mxu3 %v1109_v21 }
  0x3f   :  { %686 = vmatpush.bf16.msrb.mxu0 %v1084_v23  ;;  %699 = vmatpush.bf16.msrb.mxu1 %v1092_v24 }
  0x40   :  { %712 = vmatpush.bf16.msrb.mxu2 %v1100_v26 }
  0x41   :  { %725 = vmatpush.bf16.msrb.mxu3 %v1108_v27 }
  0x43   :  { %763 = vmatpush.bf16.msra.mxu0 %v1117_v36 }
  0x44   :  { %726 = vmatmul.bf16.vlgmr.msrb.gmra.mxu3 %v234_v33 }
  0x45   :  { %713 = vmatmul.bf16.vlgmr.msrb.gmra.mxu2 %v233_v32 }
  0x46   :  { %687 = vmatmul.bf16.vlgmr.msrb.gmra.mxu0 %v231_v34  ;;  %700 = vmatmul.bf16.vlgmr.msrb.gmra.mxu1 %v232_v35 }
  0x47   :  { %764 = vmatpush.bf16.msra.mxu0 %v1116_v37 }
  0xb3   :  { %v636_v39 = vpop.f32.mrf.mxu0  ;;  %v649_v40 = vpop.f32.mrf.mxu1 }
  0xb4   :  { %v637_v41 = vadd.f32 %v1120_v38, %v636_v39 }
  0xb6   :  { %v650_v44 = vadd.f32 %v649_v40, %v637_v41 }
  0xb7   :  { %v675_v43 = vpop.f32.mrf.mxu3 }
  0xb8   :  { %v662_v42 = vpop.f32.mrf.mxu2 }
  0xb9   :  { %v663_v47 = vadd.f32 %v662_v42, %v650_v44 }
  0xbb   :  { %v638_v45 = vpop.f32.mrf.mxu0  ;;  %v651_v46 = vpop.f32.mrf.mxu1  ;;  %v676_v50 = vadd.f32 %v675_v43, %v663_v47 }
  0xbf   :  { %v677_v49 = vpop.f32.mrf.mxu3 }
  0xc0   :  { %v664_v48 = vpop.f32.mrf.mxu2 }
  0xc3   :  { %v688_v51 = vpop.f32.mrf.mxu0  ;;  %v701_v52 = vpop.f32.mrf.mxu1 }
  0xc4   :  { %v689_v53 = vadd.f32 %v688_v51, %v676_v50 }
  0xc6   :  { %v702_v54 = vadd.f32 %v701_v52, %v689_v53 }
  0xc7   :  { %v727_v56 = vpop.f32.mrf.mxu3 }
  0xc8   :  { %v714_v55 = vpop.f32.mrf.mxu2 }
  0xc9   :  { %v715_v57 = vadd.f32 %v714_v55, %v702_v54 }
  0xcb   :  { %v728_v58 = vadd.f32 %v727_v56, %v715_v57  ;;  %v690_v59 = vpop.f32.mrf.mxu0  ;;  %v703_v60 = vpop.f32.mrf.mxu1 }
  0xcd   :  { %v731_v61 = vmax.f32 %v728_v58, 0.0 }
  0xcf   :  { %v732_v62 = vpack.c.bf16 %v731_v61, %v731_v61  ;;  %v729_v0 = vpop.f32.mrf.mxu3 }
  0xd0   :  { %v716_v63 = vpop.f32.mrf.mxu2 }
  0xd1   :  { %1051 = vmatmul.msk.bf16.vlgmr.msra.gmra.mxu0 %vm753_vm0, %v732_v62 }
 0x14e   :  { %v766_v2 = vpop.f32.mrf.mxu0 }
 0x14f   :  { %v767_v3 = vadd.f32 %v1121_v1, %v766_v2 }
 0x151   :  { %770 = vst [vmem:[#allocation3] sm:$0xff] %v767_v3 }
 0x152   :  { %781 = dma.vmem_to_hbm [thread:$0]  %s777_s15, 128, %s779_s18, [#allocation4]  }
 0x156   :  { %v768_v4 = vpop.f32.mrf.mxu0 }
 0x157   :  { %1146 = dma.done.wait [#allocation4], 128  }
 0x158   :  { %1147 = vsyncadd [#allocation4], 4294967168 }
 0x159   :  { %786 = vsyncpa [#allocation4], 1 }

</bundles_post_ra>
